<compile_context>
chip_gen: v6e
topology: v6e:2x2x1
jax: 0.10.0
libtpu: 0.0.40
codegen_flags: <defaults>
</compile_context>

<pallas_src>
import jax
import jax.numpy as jnp
from jax.experimental import pallas as pl
from jax.experimental.pallas import tpu as pltpu

IN_DIM = 136
UP_SCALE = 4
HID_DIM = UP_SCALE * IN_DIM          # 544
BN_EPS = 1e-5


def mlp_2l_kernel(x_ref, w1q_ref, s1_ref, w2q_ref, s2_ref, b2_ref, o_ref):
    x = x_ref[...]                                            # (B, 136) f32

    # ---- layer1: Linear(136 -> 544) on the MXU ----
    # int8 weights dequantized in-register to bf16 (integers <= 127 are exact
    # in bf16); the per-output-column scale is applied in f32 after the MXU,
    # so the int8 path only adds the weight-rounding error itself.
    # (b1 omitted: cancelled exactly by training-mode BatchNorm.)
    w1 = w1q_ref[...].astype(jnp.bfloat16)                    # (136, 544)
    h = jnp.dot(x.astype(jnp.bfloat16), w1,
                preferred_element_type=jnp.float32)           # (B, 544) f32
    h = h * s1_ref[...]                                       # exact f32 rescale

    # ---- BatchNorm1d, training-mode batch stats (biased var), one pass ----
    mean = jnp.mean(h, axis=0, keepdims=True)                 # (1, 544)
    mean_sq = jnp.mean(h * h, axis=0, keepdims=True)          # (1, 544)
    var = jnp.maximum(mean_sq - mean * mean, 0.0)             # clamp cancellation
    inv = jax.lax.rsqrt(var + BN_EPS)                         # EUP
    hn = (h - mean) * inv                                     # (B, 544) f32
    # gamma/beta are folded into W2'/b2' on the host, so this is the full BN.

    # ---- layer2: Linear(544 -> 136) + residual (f32 x, exact) ----
    w2 = w2q_ref[...].astype(jnp.bfloat16)                    # (544, 136)
    out = jnp.dot(hn.astype(jnp.bfloat16), w2,
                  preferred_element_type=jnp.float32)         # (B, 136) f32
    o_ref[...] = out * s2_ref[...] + b2_ref[...] + x


def _quantize_per_col(w):
    """Symmetric per-output-column int8 quantization, f32 scales."""
    s = jnp.max(jnp.abs(w), axis=0, keepdims=True) / 127.0
    s = jnp.maximum(s, 1e-12)                                 # guard zero columns
    q = jnp.clip(jnp.round(w / s), -127.0, 127.0).astype(jnp.int8)
    return q, s.astype(jnp.float32)


def prepare_kernel_params(params):
    """Host-side algebraic folding + weight-only int8 quantization."""
    w1, b1, gamma, beta, w2, b2 = params
    del b1  # dead under training-mode BatchNorm (mean subtraction absorbs it)

    # Fold the BN affine into the second Linear (exact).
    w2_folded = gamma.reshape(-1, 1) * w2                     # (544, 136)
    b2_folded = (beta @ w2 + b2).astype(jnp.float32)          # (1, 136)

    w1_q, s1 = _quantize_per_col(w1)                          # (136,544) i8, (1,544) f32
    w2_q, s2 = _quantize_per_col(w2_folded)                   # (544,136) i8, (1,136) f32
    return (w1_q, s1, w2_q, s2, b2_folded)


@jax.jit
def mlp_2l_forward(x, kernel_params):
    w1_q, s1, w2_q, s2, b2 = kernel_params
    B = x.shape[0]

    cost = pl.CostEstimate(
        flops=4 * B * IN_DIM * HID_DIM,                       # two matmuls
        transcendentals=HID_DIM,                              # one rsqrt per hidden col
        bytes_accessed=(w1_q.size + w2_q.size                 # int8 weights
                        + 4 * (x.size + s1.size + s2.size + b2.size + B * IN_DIM)),
    )

    return pl.pallas_call(
        mlp_2l_kernel,
        out_shape=jax.ShapeDtypeStruct((B, IN_DIM), jnp.float32),
        in_specs=[pl.BlockSpec(memory_space=pltpu.MemorySpace.VMEM)] * 6,
        out_specs=pl.BlockSpec(memory_space=pltpu.MemorySpace.VMEM),
        cost_estimate=cost,
    )(x, w1_q, s1, w2_q, s2, b2)


def init_params(key):
    k1, k2, k3, k4, k5, k6 = jax.random.split(key, 6)
    # Deterministic synthetic init (shapes match the PyTorch module).
    w1 = jax.random.normal(k1, (IN_DIM, HID_DIM), jnp.float32) * (1.0 / IN_DIM ** 0.5)
    b1 = jax.random.normal(k2, (1, HID_DIM), jnp.float32) * 0.01
    # Non-trivial BN affine so the gamma/beta -> W2'/b2' folding is exercised.
    gamma = 1.0 + 0.1 * jax.random.normal(k5, (1, HID_DIM), jnp.float32)
    beta = 0.1 * jax.random.normal(k6, (1, HID_DIM), jnp.float32)
    w2 = jax.random.normal(k3, (HID_DIM, IN_DIM), jnp.float32) * (1.0 / HID_DIM ** 0.5)
    b2 = jax.random.normal(k4, (1, IN_DIM), jnp.float32) * 0.01
    return (w1, b1, gamma, beta, w2, b2)


def reference_forward(x, params):
    """Straight f32 transcription of the PyTorch forward (with b1, gamma, beta)."""
    w1, b1, gamma, beta, w2, b2 = params
    h = x @ w1 + b1
    mean = jnp.mean(h, axis=0, keepdims=True)
    var = jnp.mean((h - mean) ** 2, axis=0, keepdims=True)    # biased, training mode
    h = (h - mean) / jnp.sqrt(var + BN_EPS) * gamma + beta
    return h @ w2 + b2 + x


if __name__ == "__main__":
    key = jax.random.PRNGKey(0)
    kx, kp = jax.random.split(key)

    B = 8
    x = jax.random.normal(kx, (B, IN_DIM), jnp.float32)
    params = init_params(kp)
    kernel_params = prepare_kernel_params(params)

    out = jax.block_until_ready(mlp_2l_forward(x, kernel_params))
    ref = reference_forward(x, params)

    assert out.shape == (B, IN_DIM)
    assert bool(jnp.all(jnp.isfinite(out))), "non-finite output"

    # Error budget: weight-only per-column int8 (applied per review) plus bf16
    # activation casts give an estimated output error std of ~1.1e-2 on these
    # unit-scale outputs, i.e. an expected max |err| of ~4.5e-2 over the
    # (8, 136) output; 7e-2 leaves ~5-sigma of headroom.  The b1-drop,
    # gamma/beta folding and per-column rescales are exact.
    max_err = float(jnp.max(jnp.abs(out - ref)))
    assert max_err < 7e-2, f"mismatch vs JAX reference: max |err| = {max_err}"

    print("KERNEL_OK")
</pallas_src>

<mosaic_0001>
module attributes {stable_mosaic.version = 11 : i64} {
  func.func @mlp_2l_kernel(%arg0: memref<8x136xf32, #tpu.memory_space<vmem>>, %arg1: memref<136x544xi8, #tpu.memory_space<vmem>>, %arg2: memref<1x544xf32, #tpu.memory_space<vmem>>, %arg3: memref<544x136xi8, #tpu.memory_space<vmem>>, %arg4: memref<1x136xf32, #tpu.memory_space<vmem>>, %arg5: memref<1x136xf32, #tpu.memory_space<vmem>>, %arg6: memref<8x136xf32, #tpu.memory_space<vmem>>) attributes {dimension_semantics = [], scalar_prefetch = 0 : i64, scratch_operands = 0 : i64, tpu.core_type = #tpu.core_type<tc>} {
    %c0 = arith.constant 0 : index
    %c0_0 = arith.constant 0 : index
    %0 = vector.load %arg0[%c0, %c0_0] : memref<8x136xf32, #tpu.memory_space<vmem>>, vector<8x136xf32>
    %c0_1 = arith.constant 0 : index
    %c0_2 = arith.constant 0 : index
    %1 = vector.load %arg1[%c0_1, %c0_2] : memref<136x544xi8, #tpu.memory_space<vmem>>, vector<136x544xi8>
    %2 = arith.sitofp %1 : vector<136x544xi8> to vector<136x544xbf16>
    %3 = arith.truncf %0 : vector<8x136xf32> to vector<8x136xbf16>
    %cst = arith.constant dense<0.000000e+00> : vector<8x544xf32>
    %4 = tpu.matmul %3, %2, %cst {dimension_numbers = #tpu.dot_dimension_numbers<[1], [0], [0], [1], [0, 0, 1, 1], [], []>} : vector<8x136xbf16>, vector<136x544xbf16>, vector<8x544xf32> -> vector<8x544xf32>
    %c0_3 = arith.constant 0 : index
    %c0_4 = arith.constant 0 : index
    %5 = vector.load %arg2[%c0_3, %c0_4] : memref<1x544xf32, #tpu.memory_space<vmem>>, vector<1x544xf32>
    %6 = vector.broadcast %5 : vector<1x544xf32> to vector<8x544xf32>
    %7 = arith.mulf %4, %6 : vector<8x544xf32>
    %cst_5 = arith.constant dense<0.000000e+00> : vector<544xf32>
    %8 = vector.multi_reduction <add>, %7, %cst_5 [0] : vector<8x544xf32> to vector<544xf32>
    %9 = vector.shape_cast %8 : vector<544xf32> to vector<1x544xf32>
    %cst_6 = arith.constant 8.000000e+00 : f32
    %10 = vector.broadcast %cst_6 : f32 to vector<1x544xf32>
    %11 = arith.divf %9, %10 : vector<1x544xf32>
    %12 = arith.mulf %7, %7 : vector<8x544xf32>
    %cst_7 = arith.constant dense<0.000000e+00> : vector<544xf32>
    %13 = vector.multi_reduction <add>, %12, %cst_7 [0] : vector<8x544xf32> to vector<544xf32>
    %14 = vector.shape_cast %13 : vector<544xf32> to vector<1x544xf32>
    %cst_8 = arith.constant 8.000000e+00 : f32
    %15 = vector.broadcast %cst_8 : f32 to vector<1x544xf32>
    %16 = arith.divf %14, %15 : vector<1x544xf32>
    %17 = arith.mulf %11, %11 : vector<1x544xf32>
    %18 = arith.subf %16, %17 : vector<1x544xf32>
    %cst_9 = arith.constant 0.000000e+00 : f32
    %19 = vector.broadcast %cst_9 : f32 to vector<1x544xf32>
    %20 = arith.maximumf %18, %19 : vector<1x544xf32>
    %cst_10 = arith.constant 9.99999974E-6 : f32
    %21 = vector.broadcast %cst_10 : f32 to vector<1x544xf32>
    %22 = arith.addf %20, %21 : vector<1x544xf32>
    %23 = math.rsqrt %22 : vector<1x544xf32>
    %24 = vector.broadcast %11 : vector<1x544xf32> to vector<8x544xf32>
    %25 = arith.subf %7, %24 : vector<8x544xf32>
    %26 = vector.broadcast %23 : vector<1x544xf32> to vector<8x544xf32>
    %27 = arith.mulf %25, %26 : vector<8x544xf32>
    %c0_11 = arith.constant 0 : index
    %c0_12 = arith.constant 0 : index
    %28 = vector.load %arg3[%c0_11, %c0_12] : memref<544x136xi8, #tpu.memory_space<vmem>>, vector<544x136xi8>
    %29 = arith.sitofp %28 : vector<544x136xi8> to vector<544x136xbf16>
    %30 = arith.truncf %27 : vector<8x544xf32> to vector<8x544xbf16>
    %cst_13 = arith.constant dense<0.000000e+00> : vector<8x136xf32>
    %31 = tpu.matmul %30, %29, %cst_13 {dimension_numbers = #tpu.dot_dimension_numbers<[1], [0], [0], [1], [0, 0, 1, 1], [], []>} : vector<8x544xbf16>, vector<544x136xbf16>, vector<8x136xf32> -> vector<8x136xf32>
    %c0_14 = arith.constant 0 : index
    %c0_15 = arith.constant 0 : index
    %32 = vector.load %arg4[%c0_14, %c0_15] : memref<1x136xf32, #tpu.memory_space<vmem>>, vector<1x136xf32>
    %33 = vector.broadcast %32 : vector<1x136xf32> to vector<8x136xf32>
    %34 = arith.mulf %31, %33 : vector<8x136xf32>
    %c0_16 = arith.constant 0 : index
    %c0_17 = arith.constant 0 : index
    %35 = vector.load %arg5[%c0_16, %c0_17] : memref<1x136xf32, #tpu.memory_space<vmem>>, vector<1x136xf32>
    %36 = vector.broadcast %35 : vector<1x136xf32> to vector<8x136xf32>
    %37 = arith.addf %34, %36 : vector<8x136xf32>
    %38 = arith.addf %37, %0 : vector<8x136xf32>
    %c0_18 = arith.constant 0 : index
    %c0_19 = arith.constant 0 : index
    %39 = vector.load %arg6[%c0_18, %c0_19] : memref<8x136xf32, #tpu.memory_space<vmem>>, vector<8x136xf32>
    tpu.vector_store %arg6[%c0_18, %c0_19], %38 {strides = array<i32>} : memref<8x136xf32, #tpu.memory_space<vmem>>, vector<8x136xf32>,
    return
  }
}

</mosaic_0001>

<bundles_post_ra>
// kernel: mlp_2l_forward.1
= control target key start
LH: loop header
LB: loop body
LE: loop exit
PB: predicated region body
PF: predicated region fallthrough
CT: control target
= control target key end

     0   :  { %s1352_s0 = inlined_call_operand.vmem [shape: f32[8,136], index: 0, kind: input, shape index: {}]   ;;  %s1353_s1 = inlined_call_operand.vmem [shape: s8[136,544], index: 1, kind: input, shape index: {}]   ;;  %s1354_s2 = inlined_call_operand.vmem [shape: f32[1,544], index: 2, kind: input, shape index: {}]   ;;  %s1355_s3 = inlined_call_operand.vmem [shape: s8[544,136], index: 3, kind: input, shape index: {}]   ;;  %s1356_s4 = inlined_call_operand.vmem [shape: f32[1,136], index: 4, kind: input, shape index: {}]   ;;  %s1357_s5 = inlined_call_operand.vmem [shape: f32[1,136], index: 5, kind: input, shape index: {}]   ;;  %s1358_s6 = inlined_call_operand.hbm [shape: f32[8,136], index: 6, kind: output, shape index: {}]  }
   0x1   :  { %v55_v0 = vld [vmem:[%s1353_s1 + $0x8c] sm:$0xff]  ;;  %v57_v1 = vld [vmem:[%s1353_s1 + $0x96] sm:$0xff]  ;;  %v53_v7 = vld [vmem:[%s1353_s1 + $0x82] sm:$0xff] }
   0x2   :  { %v51_v2 = vld [vmem:[%s1353_s1 + $0x78] sm:$0xff]  ;;  %v103_v3 = vunpack.c.l.s8.bf16 %v55_v0  ;;  %v106_v4 = vunpack.c.l.s8.bf16 %v57_v1  ;;  %v104_v5 = vunpack.c.h.s8.bf16 %v55_v0  ;;  %v107_v6 = vunpack.c.h.s8.bf16 %v57_v1  ;;  %v47_v12 = vld [vmem:[%s1353_s1 + $0x64] sm:$0xff]  ;;  %v49_v13 = vld [vmem:[%s1353_s1 + $0x6e] sm:$0xff] }
   0x3   :  { %v97_v8 = vunpack.c.l.s8.bf16 %v51_v2  ;;  %v100_v9 = vunpack.c.l.s8.bf16 %v53_v7  ;;  %v98_v10 = vunpack.c.h.s8.bf16 %v51_v2  ;;  %v101_v11 = vunpack.c.h.s8.bf16 %v53_v7  ;;  %v43_v18 = vld [vmem:[%s1353_s1 + $0x50] sm:$0xff]  ;;  %v45_v19 = vld [vmem:[%s1353_s1 + $0x5a] sm:$0xff]  ;;  %v41_v35 = vld [vmem:[%s1353_s1 + $0x46] sm:$0xff] }
   0x4   :  { %v938_v14 = vcombine.high %v103_v3, %v106_v4  ;;  %v940_v15 = vcombine.high %v104_v5, %v107_v6  ;;  %v937_v16 = vcombine.low %v103_v3, %v106_v4  ;;  %v939_v17 = vcombine.low %v104_v5, %v107_v6  ;;  %v39_v34 = vld [vmem:[%s1353_s1 + $0x3c] sm:$0xff]  ;;  %v35_v44 = vld [vmem:[%s1353_s1 + $0x28] sm:$0xff]  ;;  %v37_v45 = vld [vmem:[%s1353_s1 + $0x32] sm:$0xff] }
   0x5   :  { %v933_v20 = vcombine.high %v97_v8, %v100_v9  ;;  %v935_v21 = vcombine.high %v98_v10, %v101_v11  ;;  %v91_v22 = vunpack.c.l.s8.bf16 %v47_v12  ;;  %v94_v23 = vunpack.c.l.s8.bf16 %v49_v13  ;;  %v31_v54 = vld [vmem:[%s1353_s1 + $0x14] sm:$0xff]  ;;  %v1066_v55 = vld [vmem:[%s1352_s0 + $0x8] sm:$0xff]  ;;  %v33_v56 = vld [vmem:[%s1353_s1 + $0x1e] sm:$0xff] }
   0x6   :  { %355 = vmatprep.subr.bf16.mxu0 %v938_v14  ;;  %396 = vmatprep.subr.bf16.mxu1 %v940_v15  ;;  %v92_v24 = vunpack.c.h.s8.bf16 %v47_v12  ;;  %v95_v25 = vunpack.c.h.s8.bf16 %v49_v13  ;;  %v932_v26 = vcombine.low %v97_v8, %v100_v9  ;;  %v934_v27 = vcombine.low %v98_v10, %v101_v11 }
   0x7   :  { %356 = vmatpush1.bf16.msra.mxu0 %v937_v16  ;;  %397 = vmatpush1.bf16.msra.mxu1 %v939_v17  ;;  %v85_v28 = vunpack.c.l.s8.bf16 %v43_v18  ;;  %v88_v29 = vunpack.c.l.s8.bf16 %v45_v19  ;;  %v928_v30 = vcombine.high %v91_v22, %v94_v23  ;;  %v86_v32 = vunpack.c.h.s8.bf16 %v43_v18 }
   0x8   :  { %357 = vmatprep.subr.bf16.mxu0 %v933_v20  ;;  %398 = vmatprep.subr.bf16.mxu1 %v935_v21  ;;  %v930_v31 = vcombine.high %v92_v24, %v95_v25  ;;  %v89_v33 = vunpack.c.h.s8.bf16 %v45_v19  ;;  %v927_v36 = vcombine.low %v91_v22, %v94_v23  ;;  %v929_v37 = vcombine.low %v92_v24, %v95_v25 }
   0x9   :  { %v923_v38 = vcombine.high %v85_v28, %v88_v29  ;;  %v79_v39 = vunpack.c.l.s8.bf16 %v39_v34  ;;  %v82_v41 = vunpack.c.l.s8.bf16 %v41_v35  ;;  %v80_v42 = vunpack.c.h.s8.bf16 %v39_v34 }
   0xa   :  { %v925_v40 = vcombine.high %v86_v32, %v89_v33  ;;  %v83_v43 = vunpack.c.h.s8.bf16 %v41_v35  ;;  %v922_v46 = vcombine.low %v85_v28, %v88_v29  ;;  %v924_v47 = vcombine.low %v86_v32, %v89_v33 }
   0xb   :  { %358 = vmatpush1.bf16.msra.mxu0 %v932_v26  ;;  %399 = vmatpush1.bf16.msra.mxu1 %v934_v27  ;;  %v73_v48 = vunpack.c.l.s8.bf16 %v35_v44  ;;  %v76_v49 = vunpack.c.l.s8.bf16 %v37_v45  ;;  %v918_v50 = vcombine.high %v79_v39, %v82_v41  ;;  %v74_v52 = vunpack.c.h.s8.bf16 %v35_v44 }
   0xc   :  { %359 = vmatprep.subr.bf16.mxu0 %v928_v30  ;;  %400 = vmatprep.subr.bf16.mxu1 %v930_v31  ;;  %v920_v51 = vcombine.high %v80_v42, %v83_v43  ;;  %v77_v53 = vunpack.c.h.s8.bf16 %v37_v45 }
   0xf   :  { %360 = vmatpush1.bf16.msra.mxu0 %v927_v36  ;;  %401 = vmatpush1.bf16.msra.mxu1 %v929_v37 }
  0x10   :  { %361 = vmatprep.subr.bf16.mxu0 %v923_v38  ;;  %402 = vmatprep.subr.bf16.mxu1 %v925_v40 }
  0x11   :  { %11 = vsyncpa [#allocation3], 0  ;;  %v917_v57 = vcombine.low %v79_v39, %v82_v41  ;;  %vm335_vm0 = vcmask 64512   ;;  %v919_v58 = vcombine.low %v80_v42, %v83_v43  ;;  %v913_v59 = vcombine.high %v73_v48, %v76_v49  ;;  %v27_v2 = vld [vmem:[%s1353_s1] sm:$0xff]  ;;  %v29_v3 = vld [vmem:[%s1353_s1 + $0xa] sm:$0xff] }
  0x12   :  { %v67_v60 = vunpack.c.l.s8.bf16 %v31_v54  ;;  %v1073_v61 = vpack.c.bf16 %v1066_v55, %v1066_v55  ;;  %v915_v62 = vcombine.high %v74_v52, %v77_v53  ;;  %v70_v63 = vunpack.c.l.s8.bf16 %v33_v56  ;;  %v59_v12 = vld [vmem:[%s1353_s1 + $0xa0] sm:$0xff]  ;;  %v56_v25 = vld [vmem:[%s1353_s1 + $0x94] sm:$0x3]  ;;  %v58_v26 = vld [vmem:[%s1353_s1 + $0x9e] sm:$0x3] }
  0x13   :  { %362 = vmatpush1.bf16.msra.mxu0 %v922_v46  ;;  %403 = vmatpush1.bf16.msra.mxu1 %v924_v47  ;;  %v68_v0 = vunpack.c.h.s8.bf16 %v31_v54  ;;  %v71_v1 = vunpack.c.h.s8.bf16 %v33_v56  ;;  %v912_v4 = vcombine.low %v73_v48, %v76_v49  ;;  %v914_v5 = vcombine.low %v74_v52, %v77_v53  ;;  %v630_v27 = vld [vmem:[%s1355_s3 + $0x38] sm:$0xff]  ;;  %v1100_v28 = vld [vmem:[%s1352_s0] sm:$0xff]  ;;  %v54_v34 = vld [vmem:[%s1353_s1 + $0x8a] sm:$0x3] }
  0x14   :  { %363 = vmatprep.subr.bf16.mxu0 %v918_v50  ;;  %404 = vmatprep.subr.bf16.mxu1 %v920_v51  ;;  %v61_v6 = vunpack.c.l.s8.bf16 %v27_v2  ;;  %v64_v7 = vunpack.c.l.s8.bf16 %v29_v3  ;;  %v908_v8 = vcombine.high %v67_v60, %v70_v63  ;;  %v62_v10 = vunpack.c.h.s8.bf16 %v27_v2  ;;  %v52_v33 = vld [vmem:[%s1353_s1 + $0x80] sm:$0x3]  ;;  %v629_v36 = vld [vmem:[%s1355_s3 + $0x30] sm:$0xff]  ;;  %v48_v42 = vld [vmem:[%s1353_s1 + $0x6c] sm:$0x3] }
  0x15   :  { %948 = vmatprep.mubr.msk.bf16.mxu0 %vm335_vm0, %v1073_v61  ;;  %950 = vmatprep.mubr.msk.bf16.mxu1 %vm335_vm0, %v1073_v61  ;;  %v910_v9 = vcombine.high %v68_v0, %v71_v1  ;;  %v65_v11 = vunpack.c.h.s8.bf16 %v29_v3  ;;  %v907_v13 = vcombine.low %v67_v60, %v70_v63  ;;  %v909_v14 = vcombine.low %v68_v0, %v71_v1  ;;  %v50_v43 = vld [vmem:[%s1353_s1 + $0x76] sm:$0x3]  ;;  %v628_v46 = vld [vmem:[%s1355_s3 + $0x28] sm:$0xff]  ;;  %v44_v50 = vld [vmem:[%s1353_s1 + $0x58] sm:$0x3] }
  0x16   :  { %v109_v15 = vunpack.c.l.s8.bf16 %v59_v12  ;;  %v903_v16 = vcombine.high %v61_v6, %v64_v7  ;;  %v110_v18 = vunpack.c.h.s8.bf16 %v59_v12  ;;  %v902_v19 = vcombine.low %v61_v6, %v64_v7  ;;  %v46_v51 = vld [vmem:[%s1353_s1 + $0x62] sm:$0x3]  ;;  %v42_v60 = vld [vmem:[%s1353_s1 + $0x4e] sm:$0x3]  ;;  %v1153_v63 = vld [vmem:[%s1355_s3 + $0x18] sm:$0xff] }
  0x17   :  { %364 = vmatpush1.bf16.msra.mxu0 %v917_v57  ;;  %405 = vmatpush1.bf16.msra.mxu1 %v919_v58  ;;  %v905_v17 = vcombine.high %v62_v10, %v65_v11  ;;  %v904_v20 = vcombine.low %v62_v10, %v65_v11  ;;  %vm339_vm1 = vcmask 1043456   ;;  %v105_v29 = vunpack.c.l.s8.bf16 %v56_v25  ;;  %v627_v54 = vld [vmem:[%s1355_s3 + $0x20] sm:$0xff]  ;;  %v36_v3 = vld [vmem:[%s1353_s1 + $0x30] sm:$0x3]  ;;  %v32_v11 = vld [vmem:[%s1353_s1 + $0x1c] sm:$0x3] }
  0x18   :  { %365 = vmatprep.subr.bf16.mxu0 %v913_v59  ;;  %406 = vmatprep.subr.bf16.mxu1 %v915_v62  ;;  %v943_v21 = vcombine.high %v109_v15, %v109_v15  ;;  %v945_v22 = vcombine.high %v110_v18, %v110_v18  ;;  %v942_v23 = vcombine.low %v109_v15, %v109_v15  ;;  %v108_v30 = vunpack.c.l.s8.bf16 %v58_v26  ;;  %v40_v59 = vld [vmem:[%s1353_s1 + $0x44] sm:$0x3]  ;;  %v1166_v7 = vld [vmem:[%s1355_s3 + $0x10] sm:$0xff]  ;;  %v34_v12 = vld [vmem:[%s1353_s1 + $0x26] sm:$0x3] }
  0x19   :  { %v944_v24 = vcombine.low %v110_v18, %v110_v18  ;;  %v672_v35 = vunpack.c.h.s8.bf16 %v630_v27  ;;  %v1117_v37 = vpack.c.bf16 %v1100_v28, %v1100_v28  ;;  %v99_v39 = vunpack.c.l.s8.bf16 %v52_v33  ;;  %v30_v18 = vld [vmem:[%s1353_s1 + $0x12] sm:$0x3]  ;;  %v646_v26 = vld [vmem:[%s1355_s3 + $0xb8] sm:$0xff]  ;;  %v644_v33 = vld [vmem:[%s1355_s3 + $0xa8] sm:$0xff] }
  0x1a   :  { %v341_v31 = vsel %vm339_vm1, %v942_v23, 0  ;;  %v941_v38 = vcombine.low %v105_v29, %v108_v30  ;;  %v102_v40 = vunpack.c.l.s8.bf16 %v54_v34  ;;  %v987_v41 = vmov 0   ;;  %v645_v30 = vld [vmem:[%s1355_s3 + $0xb0] sm:$0xff] }
  0x1b   :  { %366 = vmatpush1.bf16.msra.mxu0 %v912_v4  ;;  %407 = vmatpush1.bf16.msra.mxu1 %v914_v5  ;;  %v347_v32 = vsel %vm339_vm1, %v944_v24, 0  ;;  %v671_v44 = vunpack.c.h.s8.bf16 %v629_v36  ;;  %v670_v45 = vunpack.c.l.s8.bf16 %v630_v27  ;;  %v93_v48 = vunpack.c.l.s8.bf16 %v48_v42  ;;  %v38_v4 = vld [vmem:[%s1353_s1 + $0x3a] sm:$0x3] }
  0x1c   :  { %367 = vmatprep.subr.bf16.mxu0 %v908_v8  ;;  %408 = vmatprep.subr.bf16.mxu1 %v910_v9  ;;  %v936_v47 = vcombine.low %v99_v39, %v102_v40  ;;  %v96_v49 = vunpack.c.l.s8.bf16 %v50_v43  ;;  %v669_v52 = vunpack.c.l.s8.bf16 %v629_v36  ;;  %v668_v53 = vunpack.c.h.s8.bf16 %v628_v46  ;;  %v643_v36 = vld [vmem:[%s1355_s3 + $0xa0] sm:$0xff]  ;;  %v642_v40 = vld [vmem:[%s1355_s3 + $0x98] sm:$0xff]  ;;  %v641_v43 = vld [vmem:[%s1355_s3 + $0x90] sm:$0xff] }
  0x1d   :  { %v87_v57 = vunpack.c.l.s8.bf16 %v44_v50  ;;  %v90_v58 = vunpack.c.l.s8.bf16 %v46_v51  ;;  %v666_v62 = vunpack.c.l.s8.bf16 %v628_v46  ;;  %v81_v1 = vunpack.c.l.s8.bf16 %v40_v59  ;;  %v640_v50 = vld [vmem:[%s1355_s3 + $0x88] sm:$0xff] }
  0x1e   :  { %v931_v56 = vcombine.low %v93_v48, %v96_v49  ;;  %v84_v2 = vunpack.c.l.s8.bf16 %v42_v60  ;;  %v665_v5 = vunpack.c.l.s8.bf16 %v627_v54  ;;  %v664_v6 = vunpack.c.h.s8.bf16 %v1153_v63  ;;  %v624_v49 = vld [vmem:[%s1355_s3 + $0x8] sm:$0xff] }
  0x1f   :  { %368 = vmatpush1.bf16.msra.mxu0 %v907_v13  ;;  %409 = vmatpush1.bf16.msra.mxu1 %v909_v14  ;;  %v926_v0 = vcombine.low %v87_v57, %v90_v58  ;;  %v75_v9 = vunpack.c.l.s8.bf16 %v36_v3  ;;  %v78_v10 = vunpack.c.l.s8.bf16 %v38_v4  ;;  %v663_v13 = vunpack.c.h.s8.bf16 %v1166_v7  ;;  %v653_v3 = vld [vmem:[%s1355_s3 + $0xf0] sm:$0xff] }
  0x20   :  { %369 = vmatprep.subr.bf16.mxu0 %v903_v16  ;;  %410 = vmatprep.subr.bf16.mxu1 %v905_v17  ;;  %v921_v8 = vcombine.low %v81_v1, %v84_v2  ;;  %v69_v15 = vunpack.c.l.s8.bf16 %v32_v11  ;;  %v72_v16 = vunpack.c.l.s8.bf16 %v34_v12  ;;  %v28_v17 = vld [vmem:[%s1353_s1 + $0x8] sm:$0x3]  ;;  %v704_v29 = vunpack.c.h.s8.bf16 %v646_v26  ;;  %v637_v2 = vld [vmem:[%s1355_s3 + $0x70] sm:$0xff] }
  0x21   :  { %v916_v14 = vcombine.low %v75_v9, %v78_v10  ;;  %v701_v34 = vunpack.c.l.s8.bf16 %v645_v30  ;;  %v698_v39 = vunpack.c.l.s8.bf16 %v644_v33  ;;  %v697_v42 = vunpack.c.l.s8.bf16 %v643_v36  ;;  %v636_v10 = vld [vmem:[%s1355_s3 + $0x68] sm:$0xff] }
  0x22   :  { %v694_v46 = vunpack.c.l.s8.bf16 %v642_v40  ;;  %v693_v48 = vunpack.c.l.s8.bf16 %v641_v43  ;;  %v660_v51 = vunpack.c.h.s8.bf16 %v624_v49  ;;  %v658_v58 = vunpack.c.l.s8.bf16 %v624_v49  ;;  %v652_v11 = vld [vmem:[%s1355_s3 + $0xe8] sm:$0xff] }
  0x23   :  { %370 = vmatpush1.bf16.msra.mxu0 %v902_v19  ;;  %411 = vmatpush1.bf16.msra.mxu1 %v904_v20  ;;  %v60_v19 = vld [vmem:[%s1353_s1 + $0xa8] sm:$0x3]  ;;  %v911_v20 = vcombine.low %v69_v15, %v72_v16  ;;  %v690_v59 = vunpack.c.l.s8.bf16 %v640_v50  ;;  %v687_v4 = vunpack.c.h.s8.bf16 %v637_v2  ;;  %v717_v9 = vunpack.c.l.s8.bf16 %v653_v3  ;;  %v651_v15 = vld [vmem:[%s1355_s3 + $0xe0] sm:$0xff] }
  0x24   :  { %947 = vmatprep.subr.msk.bf16.mxu0 %vm339_vm1, %v943_v21  ;;  %949 = vmatprep.subr.msk.bf16.mxu1 %vm339_vm1, %v945_v22  ;;  %v63_v21 = vunpack.c.l.s8.bf16 %v28_v17  ;;  %v66_v22 = vunpack.c.l.s8.bf16 %v30_v18  ;;  %v111_v23 = vunpack.c.l.s8.bf16 %v60_v19  ;;  %v684_v12 = vunpack.c.h.s8.bf16 %v636_v10 }
  0x25   :  { %v715_v17 = vunpack.c.h.s8.bf16 %v651_v15  ;;  %v682_v18 = vunpack.c.l.s8.bf16 %v636_v10  ;;  %v714_v19 = vunpack.c.l.s8.bf16 %v652_v11  ;;  %vm533_vm2 = vcmask 261120  }
  0x26   :  { %v906_v24 = vcombine.low %v63_v21, %v66_v22  ;;  %v946_v25 = vcombine.low %v111_v23, %v111_v23  ;;  %v713_v21 = vunpack.c.l.s8.bf16 %v651_v15  ;;  %v634_v22 = vld [vmem:[%s1355_s3 + $0x58] sm:$0xff] }
  0x27   :  { %386 = vmatpush2.bf16.msra.mxu0 %v341_v31  ;;  %427 = vmatpush2.bf16.msra.mxu1 %v347_v32  ;;  %v703_v31 = vunpack.c.h.s8.bf16 %v645_v30  ;;  %v702_v32 = vunpack.c.l.s8.bf16 %v646_v26  ;;  %v650_v23 = vld [vmem:[%s1355_s3 + $0xd8] sm:$0xff] }
  0x28   :  { %437 = vmatprep.subr.bf16.mxu0 %v987_v41  ;;  %733 = vmatprep.subr.bf16.mxu1 %v672_v35  ;;  %v353_v27 = vsel %vm339_vm1, %v946_v25, 0  ;;  %v700_v35 = vunpack.c.h.s8.bf16 %v644_v33  ;;  %v680_v25 = vunpack.c.h.s8.bf16 %v634_v22  ;;  %v712_v26 = vunpack.c.h.s8.bf16 %v650_v23 }
  0x2a   :  { %388 = vmatmul.mubr.bf16.vlgmr.msra.gmra.mxu0 %v1117_v37  ;;  %429 = vmatmul.mubr.bf16.vlgmr.msra.gmra.mxu1 %v1117_v37 }
  0x2b   :  { %438 = vmatpush1.bf16.msra.mxu0 %v941_v38  ;;  %951 = vmatprep.mubr.msk.bf16.mxu0 %vm335_vm0, %v1073_v61  ;;  %v667_v61 = vunpack.c.h.s8.bf16 %v627_v54  ;;  %v699_v38 = vunpack.c.h.s8.bf16 %v643_v36  ;;  %v639_v54 = vld [vmem:[%s1355_s3 + $0x80] sm:$0xff]  ;;  %v648_v36 = vld [vmem:[%s1355_s3 + $0xc8] sm:$0xff] }
  0x2c   :  { %439 = vmatprep.subr.bf16.mxu0 %v987_v41  ;;  %734 = vmatpush1.bf16.msra.mxu1 %v671_v44  ;;  %v695_v44 = vunpack.c.h.s8.bf16 %v641_v43  ;;  %v691_v57 = vunpack.c.h.s8.bf16 %v639_v54 }
  0x2d   :  { %735 = vmatprep.subr.bf16.mxu1 %v670_v45  ;;  %v662_v45 = vunpack.c.l.s8.bf16 %v1153_v63  ;;  %v654_v63 = vld [vmem:[%s1355_s3 + $0xf8] sm:$0xff] }
  0x2e   :  { %v720_v1 = vunpack.c.h.s8.bf16 %v654_v63 }
  0x2f   :  { %440 = vmatpush1.bf16.msra.mxu0 %v936_v47  ;;  %v661_v47 = vunpack.c.l.s8.bf16 %v1166_v7  ;;  %v718_v7 = vunpack.c.l.s8.bf16 %v654_v63 }
  0x30   :  { %441 = vmatprep.subr.bf16.mxu0 %v987_v41  ;;  %736 = vmatpush1.bf16.msra.mxu1 %v669_v52  ;;  %v692_v52 = vunpack.c.h.s8.bf16 %v640_v50  ;;  %v479_v50 = vlaneseq }
  0x31   :  { %737 = vmatprep.subr.bf16.mxu1 %v668_v53  ;;  %v623_v53 = vld [vmem:[%s1355_s3] sm:$0xff] }
  0x32   :  { %v657_v60 = vunpack.c.l.s8.bf16 %v623_v53 }
  0x33   :  { %442 = vmatpush1.bf16.msra.mxu0 %v931_v56  ;;  %v659_v56 = vunpack.c.h.s8.bf16 %v623_v53 }
  0x34   :  { %443 = vmatprep.subr.bf16.mxu0 %v987_v41  ;;  %738 = vmatpush1.bf16.msra.mxu1 %v667_v61  ;;  %v689_v61 = vunpack.c.l.s8.bf16 %v639_v54  ;;  %v1286_v54 = vld [vmem:[%s1354_s2] sm:$0x1f] }
  0x35   :  { %739 = vmatprep.subr.bf16.mxu1 %v666_v62  ;;  %v638_v62 = vld [vmem:[%s1355_s3 + $0x78] sm:$0xff] }
  0x37   :  { %444 = vmatpush1.bf16.msra.mxu0 %v926_v0  ;;  %v688_v0 = vunpack.c.h.s8.bf16 %v638_v62 }
  0x38   :  { %445 = vmatprep.subr.bf16.mxu0 %v987_v41  ;;  %740 = vmatpush1.bf16.msra.mxu1 %v665_v5  ;;  %v719_v5 = vunpack.c.h.s8.bf16 %v653_v3 }
  0x39   :  { %741 = vmatprep.subr.bf16.mxu1 %v664_v6  ;;  %v686_v6 = vunpack.c.l.s8.bf16 %v638_v62 }
  0x3b   :  { %446 = vmatpush1.bf16.msra.mxu0 %v921_v8  ;;  %v685_v8 = vunpack.c.l.s8.bf16 %v637_v2 }
  0x3c   :  { %447 = vmatprep.subr.bf16.mxu0 %v987_v41  ;;  %742 = vmatpush1.bf16.msra.mxu1 %v663_v13  ;;  %v716_v13 = vunpack.c.h.s8.bf16 %v652_v11 }
  0x3d   :  { %743 = vmatprep.subr.bf16.mxu1 %v662_v45  ;;  %v706_v45 = vunpack.c.l.s8.bf16 %v648_v36 }
  0x3f   :  { %448 = vmatpush1.bf16.msra.mxu0 %v916_v14  ;;  %v635_v14 = vld [vmem:[%s1355_s3 + $0x60] sm:$0xff] }
  0x40   :  { %449 = vmatprep.subr.bf16.mxu0 %v987_v41  ;;  %744 = vmatpush1.bf16.msra.mxu1 %v661_v47  ;;  %v683_v16 = vunpack.c.h.s8.bf16 %v635_v14 }
  0x41   :  { %745 = vmatprep.subr.bf16.mxu1 %v660_v51  ;;  %v1277_v51 = vshrl.u32 %v479_v50, 7 }
  0x43   :  { %450 = vmatpush1.bf16.msra.mxu0 %v911_v20  ;;  %v681_v20 = vunpack.c.l.s8.bf16 %v635_v14  ;;  %v489_v53 = vsub.s32 2, %v1277_v51 }
  0x44   :  { %451 = vmatprep.subr.bf16.mxu0 %v987_v41  ;;  %746 = vmatpush1.bf16.msra.mxu1 %v659_v56  ;;  %v1289_v56 = vsub.s32 1, %v1277_v51 }
  0x45   :  { %747 = vmatprep.subr.bf16.mxu1 %v658_v58 }
  0x46   :  { %v486_v62 = vrot.slane %v1286_v54, %v1289_v56 }
  0x47   :  { %452 = vmatpush1.bf16.msra.mxu0 %v906_v24  ;;  %v633_v24 = vld [vmem:[%s1355_s3 + $0x50] sm:$0xff] }
  0x48   :  { %467 = vmatprep.subr.bf16.mxu0 %v987_v41  ;;  %748 = vmatpush1.bf16.msra.mxu1 %v657_v60  ;;  %v677_v33 = vunpack.c.l.s8.bf16 %v633_v24 }
  0x49   :  { %749 = vmatprep.subr.bf16.mxu1 %v688_v0 }
  0x4b   :  { %468 = vmatpush2.bf16.msra.mxu0 %v353_v27  ;;  %v649_v27 = vld [vmem:[%s1355_s3 + $0xd0] sm:$0xff] }
  0x4c   :  { %774 = vmatprep.subr.bf16.mxu0 %v704_v29  ;;  %750 = vmatpush2.bf16.msra.mxu1 %v687_v4  ;;  %v679_v29 = vunpack.c.h.s8.bf16 %v633_v24  ;;  %v711_v30 = vunpack.c.h.s8.bf16 %v649_v27 }
  0x4d   :  { %751 = vmatprep.subr.bf16.mxu1 %v686_v6 }
  0x4e   :  { %470 = vmatmul.mubr.bf16.vlgmr.msra.gmra.mxu0 %v1117_v37  ;;  %v696_v37 = vunpack.c.h.s8.bf16 %v642_v40  ;;  %v631_v40 = vld [vmem:[%s1355_s3 + $0x40] sm:$0xff] }
  0x4f   :  { %775 = vmatpush1.bf16.msra.mxu0 %v703_v31  ;;  %v678_v31 = vunpack.c.l.s8.bf16 %v634_v22 }
  0x50   :  { %776 = vmatprep.subr.bf16.mxu0 %v702_v32  ;;  %752 = vmatpush2.bf16.msra.mxu1 %v685_v8  ;;  %v710_v32 = vunpack.c.l.s8.bf16 %v650_v23 }
  0x51   :  { %753 = vmatprep.subr.bf16.mxu1 %v684_v12 }
  0x53   :  { %777 = vmatpush1.bf16.msra.mxu0 %v701_v34  ;;  %v709_v34 = vunpack.c.l.s8.bf16 %v649_v27 }
  0x54   :  { %778 = vmatprep.subr.bf16.mxu0 %v700_v35  ;;  %754 = vmatpush2.bf16.msra.mxu1 %v683_v16  ;;  %v632_v35 = vld [vmem:[%s1355_s3 + $0x48] sm:$0xff] }
  0x55   :  { %755 = vmatprep.subr.bf16.mxu1 %v682_v18 }
  0x57   :  { %779 = vmatpush1.bf16.msra.mxu0 %v699_v38  ;;  %v676_v38 = vunpack.c.h.s8.bf16 %v632_v35 }
  0x58   :  { %780 = vmatprep.subr.bf16.mxu0 %v698_v39  ;;  %756 = vmatpush2.bf16.msra.mxu1 %v681_v20  ;;  %v708_v39 = vunpack.c.h.s8.bf16 %v648_v36 }
  0x59   :  { %757 = vmatprep.subr.bf16.mxu1 %v680_v25 }
  0x5b   :  { %781 = vmatpush1.bf16.msra.mxu0 %v697_v42  ;;  %v647_v42 = vld [vmem:[%s1355_s3 + $0xc0] sm:$0xff] }
  0x5c   :  { %782 = vmatprep.subr.bf16.mxu0 %v696_v37  ;;  %758 = vmatpush2.bf16.msra.mxu1 %v679_v29  ;;  %v675_v37 = vunpack.c.h.s8.bf16 %v631_v40  ;;  %v707_v43 = vunpack.c.h.s8.bf16 %v647_v42  ;;  %v705_v47 = vunpack.c.l.s8.bf16 %v647_v42 }
  0x5d   :  { %759 = vmatprep.subr.bf16.mxu1 %v678_v31 }
  0x5f   :  { %783 = vmatpush1.bf16.msra.mxu0 %v695_v44  ;;  %v674_v44 = vunpack.c.l.s8.bf16 %v632_v35 }
  0x60   :  { %784 = vmatprep.subr.bf16.mxu0 %v694_v46  ;;  %760 = vmatpush2.bf16.msra.mxu1 %v677_v33  ;;  %v673_v46 = vunpack.c.l.s8.bf16 %v631_v40 }
  0x61   :  { %761 = vmatprep.subr.bf16.mxu1 %v676_v38 }
  0x63   :  { %785 = vmatpush1.bf16.msra.mxu0 %v693_v48  ;;  %v1274_v48 = vld [vmem:[%s1355_s3 + $0x108] sm:$0xff] }
  0x64   :  { %786 = vmatprep.subr.bf16.mxu0 %v692_v52  ;;  %762 = vmatpush2.bf16.msra.mxu1 %v675_v37  ;;  %v724_v49 = vunpack.c.h.s8.bf16 %v1274_v48  ;;  %v1280_v52 = vsub.s32 0, %v1277_v51 }
  0x65   :  { %763 = vmatprep.subr.bf16.mxu1 %v674_v44 }
  0x66   :  { %v482_v58 = vrot.slane %v1286_v54, %v1280_v52 }
  0x67   :  { %787 = vmatpush1.bf16.msra.mxu0 %v691_v57  ;;  %v493_v57 = vsub.s32 3, %v1277_v51 }
  0x68   :  { %788 = vmatprep.subr.bf16.mxu0 %v690_v59  ;;  %764 = vmatpush2.bf16.msra.mxu1 %v673_v46  ;;  %v490_v59 = vrot.slane %v1286_v54, %v489_v53 }
  0x69   :  { %827 = vmatprep.subr.bf16.mxu1 %v724_v49  ;;  %v494_v63 = vrot.slane %v1286_v54, %v493_v57 }
  0x6b   :  { %789 = vmatpush1.bf16.msra.mxu0 %v689_v61 }
  0x6c   :  { %790 = vmatprep.subr.bf16.mxu0 %v720_v1 }
  0x6f   :  { %791 = vmatpush2.bf16.msra.mxu0 %v719_v5 }
  0x70   :  { %792 = vmatprep.subr.bf16.mxu0 %v718_v7 }
  0x73   :  { %793 = vmatpush2.bf16.msra.mxu0 %v717_v9 }
  0x74   :  { %794 = vmatprep.subr.bf16.mxu0 %v716_v13 }
  0x77   :  { %795 = vmatpush2.bf16.msra.mxu0 %v715_v17 }
  0x78   :  { %796 = vmatprep.subr.bf16.mxu0 %v714_v19 }
  0x7b   :  { %797 = vmatpush2.bf16.msra.mxu0 %v713_v21 }
  0x7c   :  { %798 = vmatprep.subr.bf16.mxu0 %v712_v26 }
  0x7f   :  { %799 = vmatpush2.bf16.msra.mxu0 %v711_v30 }
  0x80   :  { %800 = vmatprep.subr.bf16.mxu0 %v710_v32 }
  0x83   :  { %801 = vmatpush2.bf16.msra.mxu0 %v709_v34 }
  0x84   :  { %802 = vmatprep.subr.bf16.mxu0 %v708_v39 }
  0x87   :  { %803 = vmatpush2.bf16.msra.mxu0 %v707_v43 }
  0x88   :  { %804 = vmatprep.subr.bf16.mxu0 %v706_v45 }
  0x8b   :  { %805 = vmatpush2.bf16.msra.mxu0 %v705_v47 }
  0xea   :  { %v389_v60 = vpop.f32.mrf.mxu0  ;;  %v430_v61 = vpop.f32.mrf.mxu1 }
  0xeb   :  { %v1298_v0 = vmul.f32 %v482_v58, %v389_v60  ;;  %v1300_v1 = vmul.f32 %v490_v59, %v430_v61 }
  0xec   :  { %v391_v2 = vpop.f32.mrf.mxu0  ;;  %v432_v3 = vpop.f32.mrf.mxu1 }
  0xed   :  { %v509_v4 = vrot.slane %v1298_v0, 4  ;;  %v547_v5 = vmul.f32 %v1298_v0, %v1298_v0  ;;  %v521_v6 = vrot.slane %v1300_v1, 4  ;;  %v549_v7 = vmul.f32 %v1300_v1, %v1300_v1 }
  0xee   :  { %v1308_v8 = vmul.f32 %v486_v62, %v391_v2  ;;  %v1310_v9 = vmul.f32 %v494_v63, %v432_v3  ;;  %v393_v10 = vpop.f32.mrf.mxu0  ;;  %v434_v11 = vpop.f32.mrf.mxu1 }
  0xef   :  { %v510_v12 = vadd.f32 %v509_v4, %v1298_v0  ;;  %v552_v13 = vrot.slane %v547_v5, 4  ;;  %v522_v14 = vadd.f32 %v521_v6, %v1300_v1  ;;  %v564_v15 = vrot.slane %v549_v7, 4 }
  0xf0   :  { %v515_v16 = vrot.slane %v1308_v8, 4  ;;  %v548_v17 = vmul.f32 %v1308_v8, %v1308_v8  ;;  %v527_v18 = vrot.slane %v1310_v9, 4  ;;  %v550_v19 = vmul.f32 %v1310_v9, %v1310_v9  ;;  %v394_v20 = vpop.f32.mrf.mxu0  ;;  %v435_v21 = vpop.f32.mrf.mxu1 }
  0xf1   :  { %v511_v22 = vrot.slane %v510_v12, 2  ;;  %v553_v23 = vadd.f32 %v552_v13, %v547_v5  ;;  %v523_v24 = vrot.slane %v522_v14, 2  ;;  %v565_v25 = vadd.f32 %v564_v15, %v549_v7 }
  0xf2   :  { %v516_v26 = vadd.f32 %v515_v16, %v1308_v8  ;;  %v558_v27 = vrot.slane %v548_v17, 4  ;;  %v528_v29 = vadd.f32 %v527_v18, %v1310_v9  ;;  %v570_v30 = vrot.slane %v550_v19, 4 }
  0xf3   :  { %v512_v31 = vadd.f32 %v511_v22, %v510_v12  ;;  %v554_v32 = vrot.slane %v553_v23, 2  ;;  %v524_v33 = vadd.f32 %v523_v24, %v522_v14  ;;  %v566_v34 = vrot.slane %v565_v25, 2 }
  0xf4   :  { %v517_v35 = vrot.slane %v516_v26, 2  ;;  %v559_v36 = vadd.f32 %v558_v27, %v548_v17  ;;  %v529_v38 = vrot.slane %v528_v29, 2  ;;  %v571_v39 = vadd.f32 %v570_v30, %v550_v19 }
  0xf5   :  { %v513_v40 = vrot.slane %v512_v31, 1  ;;  %v555_v42 = vadd.f32 %v554_v32, %v553_v23  ;;  %v525_v37 = vrot.slane %v524_v33, 1  ;;  %v567_v43 = vadd.f32 %v566_v34, %v565_v25 }
  0xf6   :  { %v518_v44 = vadd.f32 %v517_v35, %v516_v26  ;;  %v560_v45 = vrot.slane %v559_v36, 2  ;;  %v530_v46 = vadd.f32 %v529_v38, %v528_v29  ;;  %v572_v47 = vrot.slane %v571_v39, 2 }
  0xf7   :  { %v514_v49 = vadd.f32 %v513_v40, %v512_v31  ;;  %v556_v50 = vrot.slane %v555_v42, 1  ;;  %v526_v53 = vadd.f32 %v525_v37, %v524_v33  ;;  %v568_v57 = vrot.slane %v567_v43, 1 }
  0xf8   :  { %v561_v58 = vadd.f32 %v560_v45, %v559_v36  ;;  %v573_v59 = vadd.f32 %v572_v47, %v571_v39  ;;  %v519_v60 = vrot.slane %v518_v44, 1  ;;  %v531_v61 = vrot.slane %v530_v46, 1 }
  0xf9   :  { %v542_v62 = vmul.f32 0.125, %v514_v49  ;;  %v557_v63 = vadd.f32 %v556_v50, %v555_v42  ;;  %v544_v2 = vmul.f32 0.125, %v526_v53  ;;  %v569_v3 = vadd.f32 %v568_v57, %v567_v43 }
  0xfa   :  { %v562_v4 = vrot.slane %v561_v58, 1  ;;  %v574_v5 = vrot.slane %v573_v59, 1  ;;  %v520_v6 = vadd.f32 %v519_v60, %v518_v44  ;;  %v532_v7 = vadd.f32 %v531_v61, %v530_v46  ;;  %v655_v61 = vld [vmem:[%s1355_s3 + $0x100] sm:$0xff] }
  0xfb   :  { %v583_v10 = vmul.f32 0.125, %v557_v63  ;;  %v588_v11 = vmul.f32 %v542_v62, %v542_v62  ;;  %v585_v12 = vmul.f32 0.125, %v569_v3  ;;  %v590_v13 = vmul.f32 %v544_v2, %v544_v2 }
  0xfc   :  { %v563_v14 = vadd.f32 %v562_v4, %v561_v58  ;;  %v575_v15 = vadd.f32 %v574_v5, %v573_v59  ;;  %v543_v17 = vmul.f32 0.125, %v520_v6  ;;  %v545_v18 = vmul.f32 0.125, %v532_v7 }
  0xfd   :  { %v593_v16 = vsub.f32 %v583_v10, %v588_v11  ;;  %v595_v19 = vsub.f32 %v585_v12, %v590_v13  ;;  %v497_v35 = vsub.s32 4, %v1277_v51  ;;  %v613_v45 = vsub.f32 %v1298_v0, %v542_v62 }
  0xfe   :  { %v584_v20 = vmul.f32 0.125, %v563_v14  ;;  %v586_v21 = vmul.f32 0.125, %v575_v15  ;;  %v589_v23 = vmul.f32 %v543_v17, %v543_v17  ;;  %v591_v24 = vmul.f32 %v545_v18, %v545_v18 }
  0xff   :  { %v598_v22 = vmax.f32 %v593_v16, 0.0  ;;  %v600_v25 = vmax.f32 %v595_v19, 0.0  ;;  %v498_v36 = vrot.slane %v1286_v54, %v497_v35  ;;  %v615_v49 = vsub.f32 %v1300_v1, %v544_v2  ;;  %v856_v35 = vld [vmem:[%s1356_s4] sm:$0x3]  ;;  %s988_s4 = smov [#allocation2]  }
 0x100   :  { %v594_v27 = vsub.f32 %v584_v20, %v589_v23  ;;  %v596_v29 = vsub.f32 %v586_v21, %v591_v24  ;;  %v614_v50 = vsub.f32 %v1308_v8, %v543_v17  ;;  %v616_v59 = vsub.f32 %v1310_v9, %v545_v18 }
 0x101   :  { %v603_v26 = vadd.f32 1e-05, %v598_v22  ;;  %v605_v30 = vadd.f32 1e-05, %v600_v25  ;;  %v723_v5 = vunpack.c.h.s8.bf16 %v655_v61  ;;  %v722_v8 = vunpack.c.l.s8.bf16 %v1274_v48 }
 0x102   :  { %v599_v31 = vmax.f32 %v594_v27, 0.0  ;;  %v601_v32 = vmax.f32 %v596_v29, 0.0  ;;  %v721_v14 = vunpack.c.l.s8.bf16 %v655_v61 }
 0x103   :  { %955 = vrsqrt.f32 %v603_v26 }
 0x104   :  { %957 = vrsqrt.f32 %v605_v30  ;;  %v604_v33 = vadd.f32 1e-05, %v599_v31  ;;  %v606_v34 = vadd.f32 1e-05, %v601_v32 }
 0x106   :  { %959 = vrsqrt.f32 %v604_v33 }
 0x107   :  { %961 = vrsqrt.f32 %v606_v34 }
 0x10e   :  { %v471_v38 = vpop.f32.mrf.mxu0 }
 0x10f   :  { %v508_v39 = vmul.f32 %v498_v36, %v471_v38  ;;  %v870_v36 = vld [vmem:[%s1357_s5] sm:$0x3]  ;;  %s894_s5 = sshll.u32 %s988_s4, 4  ;;  %s895_s5 = int_to_ptr.vmem [resolvable:$true] %s894_s5 }
 0x110   :  { %v473_v40 = vpop.f32.mrf.mxu0  ;;  %v956_v42 = vpop.eup %955  ;;  %s965_s14 = scalar_lea.vmem %s895_s5, 256  ;;  %p970_p1 = scmp.lt.s32.totalorder %s895_s5, %s895_s5 }
 0x111   :  { %v534_v37 = vsel %vm533_vm2, %v508_v39, 0.0  ;;  %v551_v43 = vmul.f32 %v508_v39, %v508_v39  ;;  %v958_v44 = vpop.eup %957  ;;  %v618_v60 = vmul.f32 %v956_v42, %v613_v45  ;;  %p966_p0 = scmp.ne.s32.totalorder %s895_s5, %s965_s14  ;;  %p971_p2 = scmp.lt.s32.totalorder %s965_s14, %s965_s14 }
 0x112   :  { %v535_v46 = vrot.slane %v534_v37, 4  ;;  %v474_v47 = vpop.f32.mrf.mxu0  ;;  %v620_v63 = vmul.f32 %v958_v44, %v615_v49  ;;  %v865_v44 = vrot.slane %v856_v35, %v1289_v56  ;;  %v879_v49 = vrot.slane %v870_v36, %v1289_v56 }
 0x113   :  { %v576_v51 = vsel %vm533_vm2, %v551_v43, 0.0  ;;  %v960_v54 = vpop.eup %959  ;;  %v725_v11 = vpack.c.bf16 %v618_v60, %v618_v60  ;;  %v875_v43 = vrot.slane %v870_v36, %v1280_v52  ;;  %p972_p3 = por %p971_p2, %p970_p1 }
 0x114   :  { %v536_v53 = vadd.f32 %v535_v46, %v534_v37  ;;  %v577_v57 = vrot.slane %v576_v51, 4  ;;  %v475_v58 = vpop.f32.mrf.mxu0  ;;  %v962_v0 = vpop.eup %961  ;;  %v619_v62 = vmul.f32 %v960_v54, %v614_v50  ;;  %v727_v9 = vpack.c.bf16 %v620_v63, %v620_v63 }
 0x115   :  { %v621_v2 = vmul.f32 %v962_v0, %v616_v59  ;;  %p973_p4 = pnand %p972_p3, %p966_p0 }
 0x116   :  { %v537_v3 = vrot.slane %v536_v53, 2  ;;  %v578_v1 = vadd.f32 %v577_v57, %v576_v51  ;;  %v726_v4 = vpack.c.bf16 %v619_v62, %v619_v62 }
 0x117   :  { %v728_v10 = vpack.c.bf16 %v621_v2, %v621_v2 }
 0x118   :  { %v538_v6 = vadd.f32 %v537_v3, %v536_v53  ;;  %v579_v7 = vrot.slane %v578_v1, 2  ;;  %765 = vmatprep.mubr.bf16.mxu1 %v726_v4 }
 0x119   :  { %806 = vmatprep.mubr.bf16.mxu0 %v728_v10  ;;  %766 = vmatmul.mubr.bf16.vlgmr.msra.gmra.mxu1 %v725_v11 }
 0x11a   :  { %v539_v12 = vrot.slane %v538_v6, 1  ;;  %v580_v13 = vadd.f32 %v579_v7, %v578_v1  ;;  %807 = vmatmul.mubr.bf16.vlgmr.msra.gmra.mxu0 %v727_v9  ;;  %828 = vmatpush1.bf16.msra.mxu1 %v723_v5 }
 0x11b   :  { %829 = vmatprep.subr.bf16.mxu1 %v722_v8  ;;  %847 = vmatprep.mubr.bf16.mxu1 %v987_v41 }
 0x11c   :  { %v540_v15 = vadd.f32 %v539_v12, %v538_v6  ;;  %v581_v16 = vrot.slane %v580_v13, 1 }
 0x11e   :  { %v546_v17 = vmul.f32 0.125, %v540_v15  ;;  %v582_v48 = vadd.f32 %v581_v16, %v580_v13  ;;  %830 = vmatpush1.bf16.msra.mxu1 %v721_v14 }
 0x120   :  { %v587_v18 = vmul.f32 0.125, %v582_v48  ;;  %v592_v19 = vmul.f32 %v546_v17, %v546_v17  ;;  %v617_v23 = vsub.f32 %v508_v39, %v546_v17  ;;  %v861_v39 = vrot.slane %v856_v35, %v1280_v52 }
 0x122   :  { %v597_v20 = vsub.f32 %v587_v18, %v592_v19 }
 0x124   :  { %v602_v21 = vmax.f32 %v597_v20, 0.0 }
 0x126   :  { %v607_v22 = vadd.f32 1e-05, %v602_v21 }
 0x128   :  { %963 = vrsqrt.f32 %v607_v22 }
 0x135   :  { %v964_v24 = vpop.eup %963 }
 0x136   :  { %v622_v25 = vmul.f32 %v964_v24, %v617_v23 }
 0x138   :  { %v729_v26 = vpack.c.bf16 %v622_v25, %v622_v25 }
 0x13a   :  { %952 = vmatmul.mubr.msk.bf16.vlgmr.msra.gmra.mxu1 %vm533_vm2, %v729_v26 }
 0x1d9   :  { %v767_v27 = vpop.f32.mrf.mxu1 }
 0x1da   :  { %v808_v29 = vpop.f32.mrf.mxu0 }
 0x1db   :  { %v769_v30 = vpop.f32.mrf.mxu1  ;;  %v809_v38 = vadd.f32 %v808_v29, %v767_v27 }
 0x1dc   :  { %v810_v31 = vpop.f32.mrf.mxu0 }
 0x1dd   :  { %v771_v41 = vpop.f32.mrf.mxu1  ;;  %v811_v42 = vadd.f32 %v810_v31, %v769_v30 }
 0x1de   :  { %v812_v32 = vpop.f32.mrf.mxu0 }
 0x1df   :  { %v772_v33 = vpop.f32.mrf.mxu1 }
 0x1e0   :  { %v813_v34 = vpop.f32.mrf.mxu0 }
 0x1fa   :  { %v849_v40 = vpop.f32.mrf.mxu1 }
 0x1fb   :  { %v850_v37 = vadd.f32 %v849_v40, %v809_v38 }
 0x1fc   :  { %v851_v45 = vpop.f32.mrf.mxu1 }
 0x1fd   :  { %v868_v46 = vmul.f32 %v861_v39, %v850_v37  ;;  %v852_v47 = vadd.f32 %v851_v45, %v811_v42 }
 0x1fe   :  { %v853_v51 = vpop.f32.mrf.mxu1 }
 0x1ff   :  { %v882_v50 = vadd.f32 %v875_v43, %v868_v46  ;;  %v869_v54 = vmul.f32 %v865_v44, %v852_v47 }
 0x200   :  { %v854_v53 = vpop.f32.mrf.mxu1 }
 0x201   :  { %v883_v57 = vadd.f32 %v879_v49, %v869_v54  ;;  %v884_v58 = vadd.f32 %v882_v50, %v1100_v28 }
 0x203   :  { %v885_v59 = vadd.f32 %v883_v57, %v1066_v55  ;;  %886 = vst [vmem:[#allocation2] sm:$0xff] %v884_v58 }
 0x205   :  { %887 = vst.msk [vmem:[#allocation2 + $0x8] sm:$0xff] %vm335_vm0, %v885_v59 }
 0x206   :  { %976 = shalt.err (!%p973_p4)
}
 0x207   :  { %897 = dma.vmem_to_hbm [thread:$0]  %s895_s5, 256, %s1358_s6, [#allocation3]  }
 0x208   :  { %985 = dma.done.wait [#allocation3], 256  }
 0x209   :  { %986 = vsyncadd [#allocation3], 4294967040 }
 0x20a   :  { %901 = vsyncpa [#allocation3], 1 }

</bundles_post_ra>
